<compile_context>
chip_gen: v7x
topology: tpu7x:2x2x1
jax: 0.10.0
libtpu: 0.0.40
codegen_flags: <defaults>
</compile_context>

<pallas_src>
import numpy as np
import jax
import jax.numpy as jnp
from jax.experimental import pallas as pl
from jax.experimental.pallas import tpu as pltpu

TWO_PI = 2.0 * np.pi
PI = np.pi

_TARGET_BLOCK_BYTES = 4 * 1024 * 1024   # per input block; out block is the same
_MAX_BLOCK_LANES = 4096                 # lane (last-dim) cap, multiple of 128
_VMEM_LIMIT_BYTES = 48 * 1024 * 1024    # explicit scoped-VMEM limit (all gens)
_MIN_SPLIT_BYTES = 2 * 1024 * 1024      # force >=2 grid steps above this size


def _round_up(n, m):
    return ((n + m - 1) // m) * m


def _choose_block(B, HW_pad, itemsize):
    """Pick (block_b, block_w, B_pad) for a lane-dense (B, HW_pad) slab.

    block_w is a multiple of 128 (HW_pad already is); block_b is either the
    full batch extent (always legal) or a multiple of 8 with B padded to a
    multiple of it, so no block violates the (8, 128) constraint.
    """
    max_elems = max(128, _TARGET_BLOCK_BYTES // itemsize)

    # Lane dim: biggest multiple of 128 <= cap that evenly divides HW_pad.
    if HW_pad <= _MAX_BLOCK_LANES:
        block_w = HW_pad
    else:
        n = HW_pad // 128
        best = 128
        for k in range(_MAX_BLOCK_LANES // 128, 0, -1):
            if n % k == 0:
                best = 128 * k
                break
        # Degenerate divisor (e.g. prime n): accept one masked edge block per
        # row sweep rather than collapsing to tiny 128-lane blocks.
        block_w = best if best >= 1024 else _MAX_BLOCK_LANES

    # Sublane dim: full extent or a multiple of 8.
    max_rows = max(1, max_elems // block_w)
    if B <= max_rows:
        block_b, B_pad = B, B
    else:
        block_b = max(8, (max_rows // 8) * 8)
        B_pad = _round_up(B, block_b)

    # Megacore (v7x has 2 TCs): keep >= 2 steps along a parallel axis for
    # non-trivial inputs so both TensorCores stream HBM.
    grid_steps = pl.cdiv(B_pad, block_b) * pl.cdiv(HW_pad, block_w)
    total_bytes = B_pad * HW_pad * itemsize
    if grid_steps == 1 and total_bytes >= _MIN_SPLIT_BYTES:
        if block_w % 256 == 0:
            block_w //= 2          # still a multiple of 128, divides HW_pad
        elif block_b % 16 == 0:
            block_b //= 2          # still a multiple of 8, divides B_pad

    return block_b, block_w, B_pad


def _phase_shift_kernel(x_ref, phi_ref, o_ref):
    # y = frac(x + phi/(2π)); the reference's where(apply_shift, y, y) is a
    # no-op and is dropped.  Pure HBM-roofline elementwise kernel.
    t = x_ref[...] + phi_ref[...]          # (bb, bw) + (bb, 1) broadcast
    o_ref[...] = t - jnp.floor(t)


def random_phase_shift(x, phase_shifts, *, donate_input=False):
    """x: (B, H, W) float in [0, 1]; phase_shifts: (B,) float radians."""
    B, H, W = x.shape
    HW = H * W
    dtype = x.dtype
    itemsize = jnp.dtype(dtype).itemsize

    x2d = x.reshape(B, HW)                                    # lane-dense slab
    # Phase offset normalized to the [0,1) circle; computed in f32 first so
    # precision is kept even if x is ever streamed in a narrower dtype.
    phi = (phase_shifts.astype(jnp.float32) / TWO_PI).astype(dtype).reshape(B, 1)

    # Lane-dense layout: pad the last dim to a multiple of 128 so every store
    # is a full unmasked vst.
    HW_pad = _round_up(HW, 128)
    block_b, block_w, B_pad = _choose_block(B, HW_pad, itemsize)

    padded = (HW_pad != HW) or (B_pad != B)
    if padded:
        x2d = jnp.pad(x2d, ((0, B_pad - B), (0, HW_pad - HW)))
        phi = jnp.pad(phi, ((0, B_pad - B), (0, 0)))

    grid = (pl.cdiv(B_pad, block_b), pl.cdiv(HW_pad, block_w))

    # Alias output onto the input slab only when that slab is a fresh
    # intermediate (padded) or the caller explicitly donates x; aliasing a
    # non-donatable parameter would force XLA to insert a defensive copy.
    aliases = {0: 0} if (padded or donate_input) else {}

    out2d = pl.pallas_call(
        _phase_shift_kernel,
        grid=grid,
        in_specs=[
            pl.BlockSpec((block_b, block_w), lambda i, j: (i, j)),
            # phi block index is constant in the innermost axis j -> redundant
            # phi DMAs across j steps are skipped.  Keep j innermost.
            pl.BlockSpec((block_b, 1), lambda i, j: (i, 0)),
        ],
        out_specs=pl.BlockSpec((block_b, block_w), lambda i, j: (i, j)),
        out_shape=jax.ShapeDtypeStruct((B_pad, HW_pad), dtype),
        input_output_aliases=aliases,
        compiler_params=pltpu.CompilerParams(
            dimension_semantics=("parallel", "parallel"),
            vmem_limit_bytes=_VMEM_LIMIT_BYTES),
    )(x2d, phi)

    if padded:
        out2d = out2d[:B, :HW]
    return out2d.reshape(B, H, W)


def random_phase_shift_module(x, key, shift_range=(-np.pi, np.pi), p=0.5):
    """Full module forward: per-batch randomness drawn in plain JAX (glue);
    the elementwise hot path runs in the Pallas kernel."""
    B = x.shape[0]
    k1, k2 = jax.random.split(key)
    # apply_shift is drawn for RNG parity with the reference, but the
    # reference's where(apply_shift, y, y) never affects the output, so it is
    # not passed to the kernel.
    # TODO(synk): if upstream intent was where(apply_shift, y, x), thread the
    # mask into the kernel as one extra per-element select.
    _ = jax.random.uniform(k1, (B,)) < p
    phase_shifts = jax.random.uniform(
        k2, (B,), minval=shift_range[0], maxval=shift_range[1]
    ).astype(jnp.float32)
    return random_phase_shift(x, phase_shifts)


def _reference_chain(x, phase_shifts):
    """Pure-JAX transcription of the original scale/shift/remainder/unscale."""
    xs = x * TWO_PI - PI
    shifted = xs + phase_shifts[:, None, None]
    shifted = jnp.remainder(shifted + PI, TWO_PI) - PI
    return (shifted + PI) / TWO_PI


def _circular_err(a, b):
    # Output lives on a circle of period 1 (frac vs remainder can differ by a
    # full wrap in the last ulp at the boundary) -> wraparound-aware compare.
    diff = np.abs(np.asarray(a, dtype=np.float64) - np.asarray(b, dtype=np.float64))
    return float(np.minimum(diff, 1.0 - diff).max())


if __name__ == "__main__":
    key = jax.random.PRNGKey(0)
    kx, krng, kx2, kphi2 = jax.random.split(key, 4)

    # Main check: module forward at a small, lane-aligned shape.
    B, H, W = 2, 16, 16
    x = jax.random.uniform(kx, (B, H, W), dtype=jnp.float32)   # values in [0, 1]
    out = jax.block_until_ready(random_phase_shift_module(x, krng))

    k1, k2 = jax.random.split(krng)
    _ = jax.random.uniform(k1, (B,)) < 0.5
    phase_shifts = jax.random.uniform(
        k2, (B,), minval=-np.pi, maxval=np.pi).astype(jnp.float32)
    ref = _reference_chain(x, phase_shifts)
    err = _circular_err(out, ref)
    assert err < 1e-5, f"max circular error {err}"

    # Secondary check: exercises the lane-padding + aliasing path (HW % 128 != 0,
    # B not a multiple of 8).
    B2, H2, W2 = 3, 10, 13
    x2 = jax.random.uniform(kx2, (B2, H2, W2), dtype=jnp.float32)
    phi2 = jax.random.uniform(
        kphi2, (B2,), minval=-np.pi, maxval=np.pi).astype(jnp.float32)
    out2 = jax.block_until_ready(random_phase_shift(x2, phi2))
    err2 = _circular_err(out2, _reference_chain(x2, phi2))
    assert err2 < 1e-5, f"max circular error (padded path) {err2}"

    print("KERNEL_OK")
</pallas_src>

<mosaic_0001>
module attributes {stable_mosaic.version = 11 : i64} {
  func.func @_phase_shift_kernel(%arg0: i32, %arg1: i32, %arg2: memref<2x256xf32, #tpu.memory_space<vmem>>, %arg3: memref<2x1xf32, #tpu.memory_space<vmem>>, %arg4: memref<2x256xf32, #tpu.memory_space<vmem>>) attributes {dimension_semantics = [#tpu.dimension_semantics<parallel>, #tpu.dimension_semantics<parallel>], iteration_bounds = array<i64: 1, 1>, scalar_prefetch = 0 : i64, scratch_operands = 0 : i64, tpu.core_type = #tpu.core_type<tc>, window_params = [{transform_indices = @transform_0, window_bounds = array<i64: 2, 256>}, {transform_indices = @transform_1, window_bounds = array<i64: 2, 1>}, {transform_indices = @transform_2, window_bounds = array<i64: 2, 256>}]} {
    %c0 = arith.constant 0 : index
    %c0_0 = arith.constant 0 : index
    %0 = vector.load %arg2[%c0, %c0_0] : memref<2x256xf32, #tpu.memory_space<vmem>>, vector<2x256xf32>
    %c0_1 = arith.constant 0 : index
    %c0_2 = arith.constant 0 : index
    %1 = vector.load %arg3[%c0_1, %c0_2] : memref<2x1xf32, #tpu.memory_space<vmem>>, vector<2x1xf32>
    %2 = vector.broadcast %1 : vector<2x1xf32> to vector<2x256xf32>
    %3 = arith.addf %0, %2 : vector<2x256xf32>
    %4 = math.floor %3 : vector<2x256xf32>
    %5 = arith.subf %3, %4 : vector<2x256xf32>
    %c0_3 = arith.constant 0 : index
    %c0_4 = arith.constant 0 : index
    %6 = vector.load %arg4[%c0_3, %c0_4] : memref<2x256xf32, #tpu.memory_space<vmem>>, vector<2x256xf32>
    tpu.vector_store %arg4[%c0_3, %c0_4], %5 {strides = array<i32>} : memref<2x256xf32, #tpu.memory_space<vmem>>, vector<2x256xf32>,
    return
  }
  func.func @transform_0(%arg0: i32, %arg1: i32) -> (i32, i32) {
    %c0_i32 = arith.constant 0 : i32
    return %arg0, %arg1 : i32, i32
  }
  func.func @transform_1(%arg0: i32, %arg1: i32) -> (i32, i32) {
    %c0_i32 = arith.constant 0 : i32
    %c0_i32_0 = arith.constant 0 : i32
    return %arg0, %c0_i32 : i32, i32
  }
  func.func @transform_2(%arg0: i32, %arg1: i32) -> (i32, i32) {
    %c0_i32 = arith.constant 0 : i32
    return %arg0, %arg1 : i32, i32
  }
}

</mosaic_0001>

<bundles_post_ra>
// kernel: tpu_custom_call.1
= control target key start
LH: loop header
LB: loop body
LE: loop exit
PB: predicated region body
PF: predicated region fallthrough
CT: control target
= control target key end

     0   :  { %7 = vsyncpa [#allocation3], 0  ;;  %s156_s0 = inlined_call_operand.hbm [shape: f32[2,256], index: 0, kind: input, shape index: {}]   ;;  %s157_s1 = inlined_call_operand.vmem [shape: f32[2,1], index: 1, kind: input, shape index: {}]   ;;  %s158_s2 = inlined_call_operand.hbm [shape: f32[2,256], index: 2, kind: output, shape index: {}]  }
   0x1   :  { %8 = vsyncpa [#allocation4], 0  ;;  %s110_s9 = smov [#allocation2]   ;;  %s62_s13 = scalar_lea.hbm %s156_s0, 64 }
   0x2   :  { %s15_s10 = sshll.u32 %s110_s9, 4  ;;  %p63_p0 = scmp.ne.s32.totalorder %s156_s0, %s62_s13  ;;  %s16_s10 = int_to_ptr.vmem [resolvable:$true] %s15_s10 }
   0x3   :  { %p66_p1 = scmp.lt.u32.totalorder %s62_s13, %s156_s0 }
   0x5   :  { %p68_p2 = pnand %p66_p1, %p63_p0 }
   0x7   :  { %71 = shalt.err (!%p68_p2)
}
   0x8   :  { %s72_s18 = scalar_lea.vmem %s16_s10, 64  ;;  %p77_p4 = scmp.lt.s32.totalorder %s16_s10, %s16_s10 }
   0x9   :  { %p73_p3 = scmp.ne.s32.totalorder %s16_s10, %s72_s18  ;;  %p78_p5 = scmp.lt.s32.totalorder %s72_s18, %s72_s18 }
   0xb   :  { %p79_p6 = por %p78_p5, %p77_p4 }
   0xd   :  { %p80_p7 = pnand %p79_p6, %p73_p3 }
   0xf   :  { %83 = shalt.err (!%p80_p7)
}
  0x10   :  { %18 = dma.hbm_to_vmem [thread:$0]  %s156_s0, 64, %s16_s10, [#allocation3]  }
  0x11   :  { %106 = dma.done.wait [#allocation3], 64  }
  0x12   :  { %107 = vsyncadd [#allocation3], 4294967232  ;;  %v111_v0 = vmov 0   ;;  %v25_v1 = vld [vmem:[%s157_s1] sm:$0x3]  ;;  %v33_v4 = vlaneseq  ;;  %s113_s0 = smov [#allocation5]  }
  0x13   :  { %61 = vset.pattern.permute.xlu0 %v111_v0  ;;  %v112_v2 = vmov 269488144   ;;  %v24_v9 = vld [vmem:[#allocation2] sm:$0xf]  ;;  %s48_s23 = sshll.u32 %s113_s0, 4  ;;  %s49_s23 = int_to_ptr.vmem [resolvable:$true] %s48_s23 }
  0x14   :  { %28 = vperm.xlu0 %61, %v25_v1   ;;  %v31_v3 = vunpack.c.l.s4 %v112_v2  ;;  %v34_v6 = vshrl.u32 %v33_v4, 7  ;;  %s84_s24 = scalar_lea.vmem %s49_s23, 64  ;;  %p89_p9 = scmp.lt.s32.totalorder %s49_s23, %s49_s23 }
  0x15   :  { %p85_p8 = scmp.ne.s32.totalorder %s49_s23, %s84_s24  ;;  %p90_p10 = scmp.lt.s32.totalorder %s84_s24, %s84_s24 }
  0x16   :  { %v32_v5 = vunpack.c.0.s8 %v31_v3 }
  0x17   :  { %p91_p11 = por %p90_p10, %p89_p9 }
  0x18   :  { %v35_v7 = vsub.s32 %v32_v5, %v34_v6 }
  0x19   :  { %p92_p12 = pnand %p91_p11, %p85_p8 }
  0x93   :  { %v29_v8 = vpop.permute.xlu0 %28 }
  0x94   :  { %v36_v10 = vrot.slane %v29_v8, %v35_v7 }
  0x96   :  { %v38_v11 = vadd.f32 %v36_v10, %v24_v9 }
  0x98   :  { %v39_v12 = vfloor.f32 %v38_v11 }
  0x9a   :  { %v40_v13 = vsub.f32 %v38_v11, %v39_v12 }
  0x9c   :  { %41 = vst [vmem:[#allocation5] sm:$0xf] %v40_v13 }
  0x9d   :  { %95 = shalt.err (!%p92_p12)
}
  0x9e   :  { %s96_s26 = scalar_lea.hbm %s158_s2, 64 }
  0x9f   :  { %p97_p13 = scmp.ne.s32.totalorder %s158_s2, %s96_s26  ;;  %p100_p0 = scmp.lt.u32.totalorder %s96_s26, %s158_s2 }
  0xa1   :  { %p102_p1 = pnand %p100_p0, %p97_p13 }
  0xa3   :  { %105 = shalt.err (!%p102_p1)
}
  0xa4   :  { %51 = dma.vmem_to_hbm [thread:$0]  %s49_s23, 64, %s158_s2, [#allocation4]  }
  0xa5   :  { %108 = dma.done.wait [#allocation4], 64  }
  0xa6   :  { %109 = vsyncadd [#allocation4], 4294967232 }
  0xa7   :  { %55 = vsyncpa [#allocation3], 1 }
  0xa8   :  { %56 = vsyncpa [#allocation4], 1 }

</bundles_post_ra>
